<compile_context>
chip_gen: v6e
topology: v6e:2x2x1
jax: 0.10.0
libtpu: 0.0.40
codegen_flags: <defaults>
</compile_context>

<pallas_src>
import functools

import jax
import jax.numpy as jnp
from jax import lax
from jax.experimental import pallas as pl
from jax.experimental.pallas import tpu as pltpu


def _round_up(x, m):
    return ((x + m - 1) // m) * m


def _choose_band_rows(h, w, c_pad):
    """Output rows per grid step.

    Targets ~4k output pixels per step (amortizes ~0.35us/step pipeline
    overhead, issues large DMAs) while keeping the (TH*W, C_PAD) f32 feature
    tile under ~6 MiB so double-buffered bands + resident weights stay well
    inside v7x's 32 MiB scoped VMEM.  TH is a multiple of 8 so the widened
    (8, C_PAD) accumulator reshape is always legal; ragged H is handled by an
    in-kernel mask, so no divisibility requirement on H.
    """
    budget_bytes = 6 * 1024 * 1024
    max_pix = max(budget_bytes // (4 * c_pad), 256)
    target_pix = min(4096, max_pix)
    th = min(max(target_pix // max(w, 1), 1), max(h // 2, 1))
    th = max(8, (th // 8) * 8)
    return th


def plantation_kernel(x_ref, wrow_ref, bconv_ref, whead_ref, bhead_ref,
                      out_ref, acc_ref, *, h_img, inv_p):
    # x_ref:     (TH+2, W, 3*Cin) bf16  row band (1-row halo) of dw-shifted image
    # wrow_ref:  (3, 3*Cin, C_PAD) bf16 conv weights grouped by dh (VMEM-resident)
    # bconv_ref: (1, C_PAD) f32
    # whead_ref: (1, C_PAD) f32         folded classifier @ fc weights
    # bhead_ref: (1,) f32 in SMEM       folded head bias (scalar)
    # out_ref:   (8, 128) f32           lane-dense output slab for this example
    # acc_ref:   (8, C_PAD) f32         widened pooled-sum accumulator
    band = pl.program_id(1)
    th = x_ref.shape[0] - 2
    w = x_ref.shape[1]
    kkr = x_ref.shape[2]
    c_pad = acc_ref.shape[1]

    @pl.when(band == 0)
    def _():
        acc_ref[...] = jnp.zeros_like(acc_ref)

    # --- fused 3x3 conv stem: dw shifts are pre-stacked on channels, so the
    #     conv is 3 bf16 MXU matmuls over dh-shifted row slices (f32 accum). ---
    x = x_ref[...]                                               # (TH+2, W, 3Cin)
    feat = jnp.dot(x[0:th].reshape(th * w, kkr), wrow_ref[0],
                   preferred_element_type=jnp.float32)           # (TH*W, C_PAD)
    for dh in (1, 2):
        feat += jnp.dot(x[dh:dh + th].reshape(th * w, kkr), wrow_ref[dh],
                        preferred_element_type=jnp.float32)
    feat = jnp.maximum(feat + bconv_ref[...], 0.0)               # bias + ReLU

    # mask padded tail rows (only emitted when H is not a multiple of TH)
    if h_img % th != 0:
        row = lax.broadcasted_iota(jnp.int32, (th * w, 1), 0) // w
        feat = jnp.where(band * th + row < h_img, feat, 0.0)

    # --- global-average-pool partial sum: 8 sublane buckets, pure VALU adds ---
    acc_ref[...] += feat.reshape(th * w // 8, 8, c_pad).sum(axis=0)

    @pl.when(band == pl.num_programs(1) - 1)
    def _():
        pooled = jnp.sum(acc_ref[...], axis=0, keepdims=True) * inv_p   # (1, C_PAD)
        # folded classifier + fc head: single VPU multiply-reduce per example
        val = jnp.sum(pooled * whead_ref[...], axis=-1, keepdims=True)
        val = val + bhead_ref[0]                                        # (1, 1)
        out_ref[...] = jnp.broadcast_to(val, out_ref.shape).astype(out_ref.dtype)


def plantation_forward(image_nchw, params):
    """image_nchw: (B, Cin, H, W) float32, PyTorch layout. Returns (B, 1)."""
    x = jnp.transpose(image_nchw, (0, 2, 3, 1)).astype(jnp.bfloat16)  # NHWC bf16
    B, H, W, Cin = x.shape
    KKR = 3 * Cin

    Cout = params["wconv"].shape[1]
    C_PAD = _round_up(Cout, 128)

    # --- image prep: dw shifts stacked on channels (W SAME-padding folded in) ---
    xw = jnp.pad(x, ((0, 0), (0, 0), (1, 1), (0, 0)))             # (B, H, W+2, Cin)
    x_shift = jnp.concatenate([xw[:, :, dw:dw + W, :] for dw in range(3)],
                              axis=-1)                            # (B, H, W, 3Cin)

    # --- row bands with 1-row halo (H SAME-padding + ragged tail folded in) ---
    TH = _choose_band_rows(H, W, C_PAD)
    n_bands = -(-H // TH)
    rows_total = n_bands * TH + 2
    x_shift = jnp.pad(x_shift, ((0, 0), (1, rows_total - H - 1), (0, 0), (0, 0)))
    band_rows = jnp.arange(n_bands)[:, None] * TH + jnp.arange(TH + 2)[None, :]
    x_bands = x_shift[:, band_rows]           # (B, n_bands, TH+2, W, 3Cin) bf16

    # --- weights: conv grouped by dh; classifier+fc folded (exact) into a vector
    wrow = params["wconv"].astype(jnp.bfloat16).reshape(3, KKR, Cout)
    wrow = jnp.pad(wrow, ((0, 0), (0, 0), (0, C_PAD - Cout)))
    bconv = jnp.pad(params["bconv"], ((0, 0), (0, C_PAD - Cout))).astype(jnp.float32)
    w_head = params["wcls"] @ params["wfc"]                       # (Cout, 1)
    b_head = params["bcls"] @ params["wfc"] + params["bfc"]       # (1, 1)
    whead = jnp.pad(w_head.T, ((0, 0), (0, C_PAD - Cout))).astype(jnp.float32)
    bhead = b_head.reshape((1,)).astype(jnp.float32)              # SMEM scalar

    flops = 2 * B * H * W * (9 * Cin) * Cout
    bytes_accessed = (int(x_bands.size) * 2 + int(wrow.size) * 2
                      + (int(bconv.size) + int(whead.size)) * 4 + B * 8 * 128 * 4)
    try:
        cost = pl.CostEstimate(flops=flops, transcendentals=0,
                               bytes_accessed=bytes_accessed)
    except Exception:                                             # pragma: no cover
        cost = None

    out = pl.pallas_call(
        functools.partial(plantation_kernel, h_img=H, inv_p=1.0 / (H * W)),
        out_shape=jax.ShapeDtypeStruct((B, 8, 128), jnp.float32),
        grid_spec=pltpu.PrefetchScalarGridSpec(
            num_scalar_prefetch=0,
            grid=(B, n_bands),
            in_specs=[
                # image row band: pipelined / double-buffered over (b, band)
                pl.BlockSpec((None, None, TH + 2, W, KKR),
                             lambda b, i: (b, i, 0, 0, 0)),
                # weights & biases: VMEM-resident (constant index_map)
                pl.BlockSpec((3, KKR, C_PAD), lambda b, i: (0, 0, 0)),
                pl.BlockSpec((1, C_PAD), lambda b, i: (0, 0)),
                pl.BlockSpec((1, C_PAD), lambda b, i: (0, 0)),
                # scalar head bias in SMEM
                pl.BlockSpec(memory_space=pltpu.MemorySpace.SMEM),
            ],
            out_specs=pl.BlockSpec((None, 8, 128), lambda b, i: (b, 0, 0)),
            scratch_shapes=[pltpu.VMEM((8, C_PAD), jnp.float32)],
        ),
        compiler_params=pltpu.CompilerParams(
            dimension_semantics=("parallel", "arbitrary"),
            vmem_limit_bytes=32 * 1024 * 1024,
        ),
        cost_estimate=cost,
    )(x_bands, wrow, bconv, whead, bhead)

    return out[:, 0, :1]                                          # (B, 1)


def im2col_3x3_same(x_nhwc):
    """(B, H, W, C) -> (B, H*W, 9*C) patches for a 3x3 SAME conv (reference)."""
    B, H, W, C = x_nhwc.shape
    xp = jnp.pad(x_nhwc, ((0, 0), (1, 1), (1, 1), (0, 0)))
    cols = []
    for dh in range(3):
        for dw in range(3):
            cols.append(xp[:, dh:dh + H, dw:dw + W, :])
    patches = jnp.stack(cols, axis=3)                             # (B, H, W, 9, C)
    return patches.reshape(B, H * W, 9 * C)


def reference_forward(image_nchw, params):
    """Pure-JAX f32 reference of the same surrogate forward pass."""
    x = jnp.transpose(image_nchw, (0, 2, 3, 1))
    patches = im2col_3x3_same(x)
    B, P, KKC = patches.shape
    feat = jnp.maximum(
        patches.reshape(B * P, KKC) @ params["wconv"] + params["bconv"], 0.0)
    pooled = feat.reshape(B, P, -1).mean(axis=1)
    logits = pooled @ params["wcls"] + params["bcls"]
    return logits @ params["wfc"] + params["bfc"]


def init_params(key, cin, hidden, num_classes):
    k = jax.random.split(key, 6)
    kkc = 9 * cin
    scale = 0.05
    return {
        "wconv": scale * jax.random.normal(k[0], (kkc, hidden), jnp.float32),
        "bconv": scale * jax.random.normal(k[1], (1, hidden), jnp.float32),
        "wcls":  scale * jax.random.normal(k[2], (hidden, num_classes), jnp.float32),
        "bcls":  scale * jax.random.normal(k[3], (1, num_classes), jnp.float32),
        "wfc":   scale * jax.random.normal(k[4], (num_classes, 1), jnp.float32),
        "bfc":   scale * jax.random.normal(k[5], (1, 1), jnp.float32),
    }


if __name__ == "__main__":
    B, Cin, H, W = 2, 4, 16, 16
    HIDDEN, NUM_CLASSES = 32, 16   # surrogate for timm classifier.out_features

    key = jax.random.PRNGKey(0)
    kx, kp = jax.random.split(key)
    image = jax.random.normal(kx, (B, Cin, H, W), jnp.float32)   # NCHW like PyTorch
    params = init_params(kp, Cin, HIDDEN, NUM_CLASSES)

    out = jax.jit(plantation_forward)(image, params)
    out = jax.block_until_ready(out)
    assert out.shape == (B, 1), out.shape

    ref = reference_forward(image, params)
    assert jnp.allclose(out, ref, rtol=5e-2, atol=2e-2), (out, ref)
    print("KERNEL_OK")
</pallas_src>

<mosaic_0001>
module attributes {stable_mosaic.version = 11 : i64} {
  func.func @plantation_kernel(%arg0: i32, %arg1: i32, %arg2: memref<1x1x10x16x12xbf16, #tpu.memory_space<vmem>>, %arg3: memref<3x12x128xbf16, #tpu.memory_space<vmem>>, %arg4: memref<1x128xf32, #tpu.memory_space<vmem>>, %arg5: memref<1x128xf32, #tpu.memory_space<vmem>>, %arg6: memref<1xf32, #tpu.memory_space<smem>>, %arg7: memref<1x8x128xf32, #tpu.memory_space<vmem>>, %arg8: memref<8x128xf32, #tpu.memory_space<vmem>>) attributes {dimension_semantics = [#tpu.dimension_semantics<parallel>, #tpu.dimension_semantics<arbitrary>], iteration_bounds = array<i64: 2, 2>, scalar_prefetch = 0 : i64, scratch_operands = 1 : i64, tpu.core_type = #tpu.core_type<tc>, window_params = [{transform_indices = @transform_0, window_bounds = array<i64: 1, 1, 10, 16, 12>}, {pipeline_mode = #tpu.pipeline_mode<synchronous>, transform_indices = @transform_1, window_bounds = array<i64: 3, 12, 128>}, {pipeline_mode = #tpu.pipeline_mode<synchronous>, transform_indices = @transform_2, window_bounds = array<i64: 1, 128>}, {pipeline_mode = #tpu.pipeline_mode<synchronous>, transform_indices = @transform_3, window_bounds = array<i64: 1, 128>}, {transform_indices = @transform_4, window_bounds = array<i64: 1>}, {transform_indices = @transform_5, window_bounds = array<i64: 1, 8, 128>}]} {
    %c0_i32 = arith.constant 0 : i32
    %0 = arith.cmpi eq, %arg1, %c0_i32 : i32
    %1 = arith.extui %0 : i1 to i32
    %c0_i32_0 = arith.constant 0 : i32
    %2 = arith.cmpi ne, %1, %c0_i32_0 : i32
    scf.if %2 {
      %cst_23 = arith.constant 0.000000e+00 : f32
      %35 = vector.broadcast %cst_23 : f32 to vector<8x128xf32>
      %c0_24 = arith.constant 0 : index
      %c0_25 = arith.constant 0 : index
      %36 = vector.load %arg8[%c0_24, %c0_25] : memref<8x128xf32, #tpu.memory_space<vmem>>, vector<8x128xf32>
      tpu.vector_store %arg8[%c0_24, %c0_25], %35 {strides = array<i32>} : memref<8x128xf32, #tpu.memory_space<vmem>>, vector<8x128xf32>,
    } else {
    }
    %c0 = arith.constant 0 : index
    %c0_1 = arith.constant 0 : index
    %c0_2 = arith.constant 0 : index
    %c0_3 = arith.constant 0 : index
    %c0_4 = arith.constant 0 : index
    %3 = vector.load %arg2[%c0, %c0_1, %c0_2, %c0_3, %c0_4] : memref<1x1x10x16x12xbf16, #tpu.memory_space<vmem>>, vector<1x1x10x16x12xbf16>
    %4 = vector.shape_cast %3 : vector<1x1x10x16x12xbf16> to vector<10x16x12xbf16>
    %5 = vector.extract_strided_slice %4 {offsets = [0, 0, 0], sizes = [8, 16, 12], strides = [1, 1, 1]} : vector<10x16x12xbf16> to vector<8x16x12xbf16>
    %6 = vector.shape_cast %5 : vector<8x16x12xbf16> to vector<128x12xbf16>
    %c0_5 = arith.constant 0 : index
    %c0_6 = arith.constant 0 : index
    %c0_7 = arith.constant 0 : index
    %7 = vector.load %arg3[%c0_5, %c0_6, %c0_7] : memref<3x12x128xbf16, #tpu.memory_space<vmem>>, vector<1x12x128xbf16>
    %8 = vector.shape_cast %7 : vector<1x12x128xbf16> to vector<12x128xbf16>
    %cst = arith.constant dense<0.000000e+00> : vector<128x128xf32>
    %9 = tpu.matmul %6, %8, %cst {dimension_numbers = #tpu.dot_dimension_numbers<[1], [0], [0], [1], [0, 0, 1, 1], [], []>} : vector<128x12xbf16>, vector<12x128xbf16>, vector<128x128xf32> -> vector<128x128xf32>
    %10 = vector.extract_strided_slice %4 {offsets = [1, 0, 0], sizes = [8, 16, 12], strides = [1, 1, 1]} : vector<10x16x12xbf16> to vector<8x16x12xbf16>
    %11 = vector.shape_cast %10 : vector<8x16x12xbf16> to vector<128x12xbf16>
    %c1 = arith.constant 1 : index
    %c0_8 = arith.constant 0 : index
    %c0_9 = arith.constant 0 : index
    %12 = vector.load %arg3[%c1, %c0_8, %c0_9] : memref<3x12x128xbf16, #tpu.memory_space<vmem>>, vector<1x12x128xbf16>
    %13 = vector.shape_cast %12 : vector<1x12x128xbf16> to vector<12x128xbf16>
    %cst_10 = arith.constant dense<0.000000e+00> : vector<128x128xf32>
    %14 = tpu.matmul %11, %13, %cst_10 {dimension_numbers = #tpu.dot_dimension_numbers<[1], [0], [0], [1], [0, 0, 1, 1], [], []>} : vector<128x12xbf16>, vector<12x128xbf16>, vector<128x128xf32> -> vector<128x128xf32>
    %15 = arith.addf %9, %14 : vector<128x128xf32>
    %16 = vector.extract_strided_slice %4 {offsets = [2, 0, 0], sizes = [8, 16, 12], strides = [1, 1, 1]} : vector<10x16x12xbf16> to vector<8x16x12xbf16>
    %17 = vector.shape_cast %16 : vector<8x16x12xbf16> to vector<128x12xbf16>
    %c2 = arith.constant 2 : index
    %c0_11 = arith.constant 0 : index
    %c0_12 = arith.constant 0 : index
    %18 = vector.load %arg3[%c2, %c0_11, %c0_12] : memref<3x12x128xbf16, #tpu.memory_space<vmem>>, vector<1x12x128xbf16>
    %19 = vector.shape_cast %18 : vector<1x12x128xbf16> to vector<12x128xbf16>
    %cst_13 = arith.constant dense<0.000000e+00> : vector<128x128xf32>
    %20 = tpu.matmul %17, %19, %cst_13 {dimension_numbers = #tpu.dot_dimension_numbers<[1], [0], [0], [1], [0, 0, 1, 1], [], []>} : vector<128x12xbf16>, vector<12x128xbf16>, vector<128x128xf32> -> vector<128x128xf32>
    %21 = arith.addf %15, %20 : vector<128x128xf32>
    %c0_14 = arith.constant 0 : index
    %c0_15 = arith.constant 0 : index
    %22 = vector.load %arg4[%c0_14, %c0_15] : memref<1x128xf32, #tpu.memory_space<vmem>>, vector<1x128xf32>
    %23 = vector.broadcast %22 : vector<1x128xf32> to vector<128x128xf32>
    %24 = arith.addf %21, %23 : vector<128x128xf32>
    %cst_16 = arith.constant 0.000000e+00 : f32
    %25 = vector.broadcast %cst_16 : f32 to vector<128x128xf32>
    %26 = arith.maximumf %24, %25 : vector<128x128xf32>
    %c0_17 = arith.constant 0 : index
    %c0_18 = arith.constant 0 : index
    %27 = vector.load %arg8[%c0_17, %c0_18] : memref<8x128xf32, #tpu.memory_space<vmem>>, vector<8x128xf32>
    %28 = vector.shape_cast %26 : vector<128x128xf32> to vector<16x8x128xf32>
    %cst_19 = arith.constant dense<0.000000e+00> : vector<8x128xf32>
    %29 = vector.multi_reduction <add>, %28, %cst_19 [0] : vector<16x8x128xf32> to vector<8x128xf32>
    %30 = arith.addf %27, %29 : vector<8x128xf32>
    %c0_20 = arith.constant 0 : index
    %c0_21 = arith.constant 0 : index
    %31 = vector.load %arg8[%c0_20, %c0_21] : memref<8x128xf32, #tpu.memory_space<vmem>>, vector<8x128xf32>
    tpu.vector_store %arg8[%c0_20, %c0_21], %30 {strides = array<i32>} : memref<8x128xf32, #tpu.memory_space<vmem>>, vector<8x128xf32>,
    %c1_i32 = arith.constant 1 : i32
    %32 = arith.cmpi eq, %arg1, %c1_i32 : i32
    %33 = arith.extui %32 : i1 to i32
    %c0_i32_22 = arith.constant 0 : i32
    %34 = arith.cmpi ne, %33, %c0_i32_22 : i32
    scf.if %34 {
      %c0_23 = arith.constant 0 : index
      %c0_24 = arith.constant 0 : index
      %35 = vector.load %arg8[%c0_23, %c0_24] : memref<8x128xf32, #tpu.memory_space<vmem>>, vector<8x128xf32>
      %cst_25 = arith.constant dense<0.000000e+00> : vector<128xf32>
      %36 = vector.multi_reduction <add>, %35, %cst_25 [0] : vector<8x128xf32> to vector<128xf32>
      %37 = vector.shape_cast %36 : vector<128xf32> to vector<1x128xf32>
      %cst_26 = arith.constant 3.906250e-03 : f32
      %38 = vector.broadcast %cst_26 : f32 to vector<1x128xf32>
      %39 = arith.mulf %37, %38 : vector<1x128xf32>
      %c0_27 = arith.constant 0 : index
      %c0_28 = arith.constant 0 : index
      %40 = vector.load %arg5[%c0_27, %c0_28] : memref<1x128xf32, #tpu.memory_space<vmem>>, vector<1x128xf32>
      %41 = arith.mulf %39, %40 : vector<1x128xf32>
      %cst_29 = arith.constant dense<0.000000e+00> : vector<1xf32>
      %42 = vector.multi_reduction <add>, %41, %cst_29 [1] : vector<1x128xf32> to vector<1xf32>
      %43 = vector.shape_cast %42 : vector<1xf32> to vector<1x1xf32>
      %c0_30 = arith.constant 0 : index
      %44 = memref.load %arg6[%c0_30] : memref<1xf32, #tpu.memory_space<smem>>
      %45 = vector.broadcast %44 : f32 to vector<1x1xf32>
      %46 = arith.addf %43, %45 : vector<1x1xf32>
      %47 = vector.shape_cast %46 : vector<1x1xf32> to vector<1x1xf32>
      %48 = vector.broadcast %47 : vector<1x1xf32> to vector<8x128xf32>
      %c0_31 = arith.constant 0 : index
      %c0_32 = arith.constant 0 : index
      %c0_33 = arith.constant 0 : index
      %49 = vector.load %arg7[%c0_31, %c0_32, %c0_33] : memref<1x8x128xf32, #tpu.memory_space<vmem>>, vector<1x8x128xf32>
      %50 = vector.shape_cast %49 : vector<1x8x128xf32> to vector<8x128xf32>
      %51 = vector.shape_cast %48 : vector<8x128xf32> to vector<1x8x128xf32>
      tpu.vector_store %arg7[%c0_31, %c0_32, %c0_33], %51 {strides = array<i32>} : memref<1x8x128xf32, #tpu.memory_space<vmem>>, vector<1x8x128xf32>,
    } else {
    }
    return
  }
  func.func @transform_0(%arg0: i32, %arg1: i32) -> (i32, i32, i32, i32, i32) {
    %c0_i32 = arith.constant 0 : i32
    %c0_i32_0 = arith.constant 0 : i32
    %c0_i32_1 = arith.constant 0 : i32
    %c0_i32_2 = arith.constant 0 : i32
    return %arg0, %arg1, %c0_i32, %c0_i32_0, %c0_i32_1 : i32, i32, i32, i32, i32
  }
  func.func @transform_1(%arg0: i32, %arg1: i32) -> (i32, i32, i32) {
    %c0_i32 = arith.constant 0 : i32
    %c0_i32_0 = arith.constant 0 : i32
    %c0_i32_1 = arith.constant 0 : i32
    %c0_i32_2 = arith.constant 0 : i32
    return %c0_i32, %c0_i32_0, %c0_i32_1 : i32, i32, i32
  }
  func.func @transform_2(%arg0: i32, %arg1: i32) -> (i32, i32) {
    %c0_i32 = arith.constant 0 : i32
    %c0_i32_0 = arith.constant 0 : i32
    %c0_i32_1 = arith.constant 0 : i32
    return %c0_i32, %c0_i32_0 : i32, i32
  }
  func.func @transform_3(%arg0: i32, %arg1: i32) -> (i32, i32) {
    %c0_i32 = arith.constant 0 : i32
    %c0_i32_0 = arith.constant 0 : i32
    %c0_i32_1 = arith.constant 0 : i32
    return %c0_i32, %c0_i32_0 : i32, i32
  }
  func.func @transform_4(%arg0: i32, %arg1: i32) -> i32 {
    %c0_i32 = arith.constant 0 : i32
    %c0_i32_0 = arith.constant 0 : i32
    return %c0_i32 : i32
  }
  func.func @transform_5(%arg0: i32, %arg1: i32) -> (i32, i32, i32) {
    %c0_i32 = arith.constant 0 : i32
    %c0_i32_0 = arith.constant 0 : i32
    %c0_i32_1 = arith.constant 0 : i32
    return %arg0, %c0_i32, %c0_i32_0 : i32, i32, i32
  }
}

</mosaic_0001>

<bundles_post_ra>
// kernel: plantation_forward.1
= control target key start
LH: loop header
LB: loop body
LE: loop exit
PB: predicated region body
PF: predicated region fallthrough
CT: control target
= control target key end

     0   :  { %s1123_s20 = smov 0   ;;  %s1125_s21 = smov 0   ;;  %s1283_s0 = inlined_call_operand.vmem [shape: bf16[2,2,10,16,12], index: 0, kind: input, shape index: {}]   ;;  %s1284_s1 = inlined_call_operand.vmem [shape: bf16[3,12,128], index: 1, kind: input, shape index: {}]   ;;  %s1285_s2 = inlined_call_operand.vmem [shape: f32[1,128], index: 2, kind: input, shape index: {}]   ;;  %s1286_s3 = inlined_call_operand.vmem [shape: f32[1,128], index: 3, kind: input, shape index: {}]   ;;  %s1287_s4 = inlined_call_operand.<no memory space> [shape: f32[1], index: 4, kind: input, shape index: {}]   ;;  %s1288_s5 = inlined_call_operand.vmem [shape: f32[2,8,128], index: 5, kind: output, shape index: {}]  }
   0x1   :  { %10 = sst [smem:[#allocation3]] %s1287_s4  ;;  %s1127_s22 = smov 0  }
   0x2   :  { %s1129_s23 = smov 0   ;;  %s1131_s24 = smov 0  }
   0x3 LB: > { %s25_s4 = sadd.s32 1, %s1079_s22  ;;  %s28_s25 = sadd.s32 1, %s1083_s23  ;;  %s1087_s24 = sphi %s1131_s24, %s16_s24   ;;  %s1083_s23 = sphi %s1129_s23, %s1292_s23   ;;  %s1079_s22 = sphi %s1127_s22, %s1291_s22   ;;  %s1075_s21 = sphi %s1125_s21, %s1290_s21   ;;  %s1071_s20 = sphi %s1123_s20, %s1289_s20  }
   0x4   : > { %p26_p0 = scmp.ge.s32.totalorder %s25_s4, 2  ;;  %p857_p1 = scmp.ge.s32.totalorder %s1087_s24, 1 }
   0x5   : > { %p206_p2 = scmp.lt.s32.totalorder %s1087_s24, 5 }
   0x6   : > { %s1294_s4 = smov (%p26_p0, %s25_s4), 0  ;;  %s1296_s25 = smov (!%p26_p0, %s28_s25), %s1083_s23 }
   0x7   : > { %p207_p3 = pnand %p857_p1, %p206_p2  ;;  %p30_p4 = scmp.ge.s32.totalorder %s1296_s25, 2 }
   0x8   : > { %p237_p5 = scmp.lt.s32.totalorder (!%p207_p3), %s1075_s21, 1  ;;  %p239_p6 = scmp.lt.s32.totalorder (!%p207_p3), %s1071_s20, 1 }
   0x9   : > { %s1298_s25 = smov (%p30_p4, %s1296_s25), 0  ;;  %210 = sbr.rel (%p207_p3) target bundleno = 453 (0x1c5), region = 40 }
   0xa   : > { %p860_p7 = scmp.ne.s32.totalorder (!%p207_p3), %s1071_s20, 0 }
   0xe   : > { %s1300_s21 = smov (!%p237_p5, %s1075_s21), 1 }
   0xf   : > { %s240_s26 = scalar_select %p239_p6, %s1071_s20, 1 }
  0x10   : > { %s994_s27 = smul.u32 40, %s1300_s21  ;;  %s859_s28 = sshll.u32 %s1300_s21, 3 }
  0x11   : > { %s993_s29 = smul.u32 20, %s240_s26  ;;  %s1160_s7 = scalar_lea.vmem %s1288_s5, %s859_s28 }
  0x12   : > { %254 = sbr.rel (%p860_p7) target bundleno = 25 (0x19), region = 44 }
  0x13   : > { %s243_s8 = sadd.s32 %s994_s27, %s993_s29 }
  0x14   : > { %s858_s9 = sshll.u32 %s243_s8, 2 }
  0x15   : > { %s1165_s12 = scalar_lea.vmem %s1283_s0, %s858_s9 }
  0x17   : > { %v1089_v0 = vmov 0.0  }
  0x18   : > { %255 = vst [vmem:[#allocation2] sm:$0xff] %v1089_v0 }
  0x19 PF: > { %v1036_v1 = vld [vmem:[%s1284_s1 + $0x8] sm:$0x3f]   ;;  %vm351_vm0 = vcmask 1045504   ;;  %vm326_vm1 = vcmask 97280   ;;  %v1039_v5 = vld [vmem:[%s1165_s12 + $0x10] sm:$0xff]   ;;  %v1043_v10 = vld [vmem:[%s1165_s12 + $0x18] sm:$0xff]  }
  0x1a   : > { %v1037_v2 = vld [vmem:[%s1165_s12 + $0x8] sm:$0xff]   ;;  %989 = vmatprep.subr.msk.bf16.mxu0 %vm351_vm0, %v1036_v1  ;;  %990 = vmatprep.subr.msk.bf16.mxu1 %vm351_vm0, %v1036_v1  ;;  %v353_v3 = vsel %vm351_vm0, %v1036_v1, 0  ;;  %v1040_v6 = vld [vmem:[%s1165_s12 + $0x30] sm:$0xff]   ;;  %v1041_v7 = vld [vmem:[%s1284_s1] sm:$0x3f]   ;;  %p903_p8 = scmp.ne.s32.totalorder %s1071_s20, 1 }
  0x1b   : > { %934 = vmatpush3.bf16.msra.mxu0 %v353_v3  ;;  %988 = vmatpush3.bf16.msra.mxu1 %v353_v3  ;;  %v1038_v4 = vld [vmem:[%s1165_s12 + $0x28] sm:$0xff]   ;;  %v1042_v8 = vld [vmem:[%s1284_s1 + $0x10] sm:$0x3f]   ;;  %v466_v9 = vsel %vm351_vm0, %v1041_v7, 0  ;;  %v1044_v12 = vld [vmem:[%s1165_s12 + $0x38] sm:$0xff]   ;;  %s772_s28 = sld [smem:[#allocation3]] (!%p903_p8) }
  0x1c   : > { %935 = vmatprep.mubr.msk.bf16.mxu0 %vm326_vm1, %v1037_v2  ;;  %943 = vmatprep.mubr.msk.bf16.mxu1 %vm326_vm1, %v1038_v4  ;;  %v582_v11 = vsel %vm351_vm0, %v1042_v8, 0  ;;  %v1045_v13 = vld [vmem:[%s1165_s12 + $0x20] sm:$0xff]   ;;  %v1048_v16 = vld [vmem:[%s1165_s12 + $0x48] sm:$0xff]  }
  0x1d   : > { %991 = vmatprep.subr.msk.bf16.mxu1 %vm351_vm0, %v1041_v7  ;;  %992 = vmatprep.subr.msk.bf16.mxu0 %vm351_vm0, %v1042_v8  ;;  %v1046_v14 = vld [vmem:[%s1165_s12 + $0x40] sm:$0xff]  }
  0x1e   : > { %936 = vmatmul.mubr.msk.bf16.vlgmr.msra.gmra.mxu0 %vm326_vm1, %v1039_v5  ;;  %944 = vmatmul.mubr.msk.bf16.vlgmr.msra.gmra.mxu1 %vm326_vm1, %v1040_v6  ;;  %v1047_v15 = vld [vmem:[%s1165_s12] sm:$0xff]  }
  0x1f   : > { %952 = vmatpush3.bf16.msra.mxu1 %v466_v9  ;;  %970 = vmatpush3.bf16.msra.mxu0 %v582_v11  ;;  %v1237_v48 = vld [vmem:[%s1285_s2] ss:$0 sm:$0xff] }
  0x20   : > { %939 = vmatprep.mubr.msk.bf16.mxu0 %vm326_vm1, %v1043_v10  ;;  %947 = vmatprep.mubr.msk.bf16.mxu1 %vm326_vm1, %v1044_v12 }
  0x26   : > { %940 = vmatmul.mubr.msk.bf16.gmra.mxu0 %vm326_vm1, %v1045_v13  ;;  %948 = vmatmul.mubr.msk.bf16.gmra.mxu1 %vm326_vm1, %v1046_v14 }
  0x27   : > { %971 = vmatprep.mubr.msk.bf16.mxu0 %vm326_vm1, %v1039_v5  ;;  %953 = vmatprep.mubr.msk.bf16.mxu1 %vm326_vm1, %v1047_v15 }
  0x2e   : > { %972 = vmatmul.mubr.msk.bf16.vlgmr.msra.gmra.mxu0 %vm326_vm1, %v1043_v10  ;;  %954 = vmatmul.mubr.msk.bf16.vlgmr.msra.gmra.mxu1 %vm326_vm1, %v1037_v2 }
  0x2f   : > { %975 = vmatprep.mubr.msk.bf16.mxu0 %vm326_vm1, %v1045_v13  ;;  %957 = vmatprep.mubr.msk.bf16.mxu1 %vm326_vm1, %v1039_v5 }
  0x36   : > { %976 = vmatmul.mubr.msk.bf16.gmra.mxu0 %vm326_vm1, %v1038_v4  ;;  %958 = vmatmul.mubr.msk.bf16.gmra.mxu1 %vm326_vm1, %v1043_v10 }
  0x37   : > { %979 = vmatprep.mubr.msk.bf16.mxu0 %vm326_vm1, %v1040_v6  ;;  %961 = vmatprep.mubr.msk.bf16.mxu1 %vm326_vm1, %v1045_v13 }
  0x3e   : > { %980 = vmatmul.mubr.msk.bf16.gmra.mxu0 %vm326_vm1, %v1044_v12  ;;  %962 = vmatmul.mubr.msk.bf16.gmra.mxu1 %vm326_vm1, %v1038_v4 }
  0x3f   : > { %983 = vmatprep.mubr.msk.bf16.mxu0 %vm326_vm1, %v1046_v14  ;;  %965 = vmatprep.mubr.msk.bf16.mxu1 %vm326_vm1, %v1040_v6 }
  0x46   : > { %984 = vmatmul.mubr.msk.bf16.gmra.mxu0 %vm326_vm1, %v1048_v16  ;;  %966 = vmatmul.mubr.msk.bf16.gmra.mxu1 %vm326_vm1, %v1044_v12 }
  0xde   : > { %v937_v17 = vpop.f32.mrf.mxu0  ;;  %v1218_v18 = vpop.f32.mrf.mxu1 }
  0xe0   : > { %v389_v19 = vpop.f32.mrf.mxu0  ;;  %v1220_v20 = vpop.f32.mrf.mxu1 }
  0xe2   : > { %v938_v21 = vpop.f32.mrf.mxu0  ;;  %v1222_v22 = vpop.f32.mrf.mxu1 }
  0xe4   : > { %v392_v23 = vpop.f32.mrf.mxu0  ;;  %v1224_v24 = vpop.f32.mrf.mxu1 }
  0xe6   : > { %v941_v25 = vpop.f32.mrf.mxu0  ;;  %v1226_v26 = vpop.f32.mrf.mxu1 }
  0xe8   : > { %v405_v27 = vpop.f32.mrf.mxu0  ;;  %v1228_v28 = vpop.f32.mrf.mxu1 }
  0xea   : > { %v942_v29 = vpop.f32.mrf.mxu0  ;;  %v1230_v30 = vpop.f32.mrf.mxu1 }
  0xec   : > { %v408_v31 = vpop.f32.mrf.mxu0  ;;  %v1232_v32 = vpop.f32.mrf.mxu1 }
  0xee   : > { %v973_v33 = vpop.f32.mrf.mxu0  ;;  %v955_v34 = vpop.f32.mrf.mxu1 }
  0xef   : > { %v511_v37 = vadd.f32 %v955_v34, %v937_v17 }
  0xf0   : > { %v618_v35 = vpop.f32.mrf.mxu0  ;;  %v502_v36 = vpop.f32.mrf.mxu1 }
  0xf1   : > { %v503_v38 = vadd.f32 %v502_v36, %v389_v19  ;;  %v683_v45 = vadd.f32 %v973_v33, %v511_v37 }
  0xf2   : > { %v974_v39 = vpop.f32.mrf.mxu0  ;;  %v956_v40 = vpop.f32.mrf.mxu1 }
  0xf3   : > { %v681_v41 = vadd.f32 %v618_v35, %v503_v38  ;;  %v514_v42 = vadd.f32 %v956_v40, %v938_v21  ;;  %v706_v55 = vadd.f32 %v1237_v48, %v683_v45 }
  0xf4   : > { %v621_v43 = vpop.f32.mrf.mxu0  ;;  %v505_v44 = vpop.f32.mrf.mxu1 }
  0xf5   : > { %v506_v46 = vadd.f32 %v505_v44, %v392_v23  ;;  %v704_v50 = vadd.f32 %v1237_v48, %v681_v41  ;;  %v684_v51 = vadd.f32 %v974_v39, %v514_v42  ;;  %v722_v4 = vmax.f32 %v706_v55, 0.0 }
  0xf6   : > { %v977_v47 = vpop.f32.mrf.mxu0  ;;  %v959_v49 = vpop.f32.mrf.mxu1 }
  0xf7   : > { %v682_v52 = vadd.f32 %v621_v43, %v506_v46  ;;  %v527_v59 = vadd.f32 %v959_v49, %v941_v25  ;;  %v720_v61 = vmax.f32 %v704_v50, 0.0  ;;  %v707_v62 = vadd.f32 %v1237_v48, %v684_v51 }
  0xf8   : > { %v634_v53 = vpop.f32.mrf.mxu0  ;;  %v518_v54 = vpop.f32.mrf.mxu1 }
  0xf9   : > { %v705_v56 = vadd.f32 %v1237_v48, %v682_v52  ;;  %v519_v57 = vadd.f32 %v518_v54, %v405_v27  ;;  %v687_v8 = vadd.f32 %v977_v47, %v527_v59  ;;  %v723_v11 = vmax.f32 %v707_v62, 0.0 }
  0xfa   : > { %v978_v58 = vpop.f32.mrf.mxu0  ;;  %v960_v60 = vpop.f32.mrf.mxu1 }
  0xfb   : > { %v721_v63 = vmax.f32 %v705_v56, 0.0  ;;  %v685_v0 = vadd.f32 %v634_v53, %v519_v57  ;;  %v530_v2 = vadd.f32 %v960_v60, %v942_v29  ;;  %v710_v25 = vadd.f32 %v1237_v48, %v687_v8 }
  0xfc   : > { %v637_v1 = vpop.f32.mrf.mxu0  ;;  %v521_v3 = vpop.f32.mrf.mxu1 }
  0xfd   : > { %v737_v5 = vadd.f32 %v721_v63, %v720_v61  ;;  %v708_v6 = vadd.f32 %v1237_v48, %v685_v0  ;;  %v522_v9 = vadd.f32 %v521_v3, %v408_v31  ;;  %v688_v14 = vadd.f32 %v978_v58, %v530_v2 }
  0xfe   : > { %v981_v7 = vpop.f32.mrf.mxu0  ;;  %v963_v10 = vpop.f32.mrf.mxu1  ;;  %v726_v41 = vmax.f32 %v710_v25, 0.0 }
  0xff   : > { %v738_v12 = vadd.f32 %v737_v5, %v722_v4  ;;  %v686_v15 = vadd.f32 %v637_v1, %v522_v9  ;;  %v724_v17 = vmax.f32 %v708_v6, 0.0  ;;  %v543_v29 = vadd.f32 %v963_v10, %v1218_v18 }
 0x100   : > { %v650_v13 = vpop.f32.mrf.mxu0  ;;  %v534_v16 = vpop.f32.mrf.mxu1  ;;  %v711_v36 = vadd.f32 %v1237_v48, %v688_v14 }
 0x101   : > { %v739_v19 = vadd.f32 %v738_v12, %v723_v11  ;;  %v535_v21 = vadd.f32 %v534_v16, %v1220_v20  ;;  %v709_v27 = vadd.f32 %v1237_v48, %v686_v15  ;;  %v691_v43 = vadd.f32 %v981_v7, %v543_v29 }
 0x102   : > { %v982_v23 = vpop.f32.mrf.mxu0  ;;  %v964_v33 = vpop.f32.mrf.mxu1  ;;  %v727_v47 = vmax.f32 %v711_v36, 0.0 }
 0x103   : > { %v740_v31 = vadd.f32 %v739_v19, %v724_v17  ;;  %v689_v34 = vadd.f32 %v650_v13, %v535_v21  ;;  %v725_v37 = vmax.f32 %v709_v27, 0.0  ;;  %v546_v38 = vadd.f32 %v964_v33, %v1222_v22  ;;  %v736_v17 = vld [vmem:[#allocation2] sm:$0xff] }
 0x104   : > { %v653_v35 = vpop.f32.mrf.mxu0  ;;  %v537_v39 = vpop.f32.mrf.mxu1  ;;  %v714_v53 = vadd.f32 %v1237_v48, %v691_v43 }
 0x105   : > { %v538_v40 = vadd.f32 %v537_v39, %v1224_v24  ;;  %v741_v42 = vadd.f32 %v740_v31, %v725_v37  ;;  %v712_v44 = vadd.f32 %v1237_v48, %v689_v34  ;;  %v692_v50 = vadd.f32 %v982_v23, %v546_v38 }
 0x106   : > { %v985_v20 = vpop.f32.mrf.mxu0  ;;  %v967_v45 = vpop.f32.mrf.mxu1  ;;  %v730_v1 = vmax.f32 %v714_v53, 0.0 }
 0x107   : > { %v690_v18 = vadd.f32 %v653_v35, %v538_v40  ;;  %v742_v49 = vadd.f32 %v741_v42, %v726_v41  ;;  %v728_v24 = vmax.f32 %v712_v44, 0.0  ;;  %v559_v55 = vadd.f32 %v967_v45, %v1226_v26 }
 0x108   : > { %v666_v46 = vpop.f32.mrf.mxu0  ;;  %v550_v51 = vpop.f32.mrf.mxu1  ;;  %v715_v61 = vadd.f32 %v1237_v48, %v692_v50 }
 0x109   : > { %v713_v52 = vadd.f32 %v1237_v48, %v690_v18  ;;  %v551_v22 = vadd.f32 %v550_v51, %v1228_v28  ;;  %v743_v54 = vadd.f32 %v742_v49, %v727_v47  ;;  %v695_v2 = vadd.f32 %v985_v20, %v559_v55 }
 0x10a   : > { %v968_v56 = vpop.f32.mrf.mxu1  ;;  %v986_v57 = vpop.f32.mrf.mxu0  ;;  %v731_v26 = vmax.f32 %v715_v61, 0.0 }
 0x10b   : > { %v729_v58 = vmax.f32 %v713_v52, 0.0  ;;  %v693_v59 = vadd.f32 %v666_v46, %v551_v22  ;;  %v744_v60 = vadd.f32 %v743_v54, %v728_v24  ;;  %v562_v62 = vadd.f32 %v968_v56, %v1230_v30 }
 0x10c   : > { %v553_v63 = vpop.f32.mrf.mxu1  ;;  %v669_v4 = vpop.f32.mrf.mxu0  ;;  %v718_v9 = vadd.f32 %v1237_v48, %v695_v2 }
 0x10d   : > { %v554_v0 = vadd.f32 %v553_v63, %v1232_v32  ;;  %v745_v28 = vadd.f32 %v744_v60, %v729_v58  ;;  %v716_v3 = vadd.f32 %v1237_v48, %v693_v59  ;;  %v696_v7 = vadd.f32 %v986_v57, %v562_v62 }
 0x10e   : > { %v734_v13 = vmax.f32 %v718_v9, 0.0 }
 0x10f   : > { %v694_v5 = vadd.f32 %v669_v4, %v554_v0  ;;  %v746_v6 = vadd.f32 %v745_v28, %v730_v1  ;;  %v732_v10 = vmax.f32 %v716_v3, 0.0  ;;  %v719_v32 = vadd.f32 %v1237_v48, %v696_v7 }
 0x111   : > { %v717_v8 = vadd.f32 %v1237_v48, %v694_v5  ;;  %v747_v11 = vadd.f32 %v746_v6, %v731_v26  ;;  %v735_v15 = vmax.f32 %v719_v32, 0.0 }
 0x113   : > { %v733_v30 = vmax.f32 %v717_v8, 0.0  ;;  %v748_v12 = vadd.f32 %v747_v11, %v732_v10 }
 0x115   : > { %v749_v14 = vadd.f32 %v748_v12, %v733_v30 }
 0x117   : > { %v750_v16 = vadd.f32 %v749_v14, %v734_v13 }
 0x119   : > { %v751_v19 = vadd.f32 %v750_v16, %v735_v15  ;;  %757 = sbr.rel (%p903_p8) target bundleno = 453 (0x1c5), region = 48 }
 0x11b   : > { %v752_v21 = vadd.f32 %v751_v19, %v736_v17 }
 0x11d   : > { %753 = vst [vmem:[#allocation2] sm:$0xff] %v752_v21 }
 0x11e   : > { %v766_v48 = vld [vmem:[%s1286_s3] sm:$0x1]  ;;  %vm768_vm2 = vcmask 1040384   ;;  %v775_v38 = vlaneseq  ;;  %v773_v40 = vstv %s772_s28 }
 0x120   : > { %v776_v39 = vshrl.u32 %v775_v38, 7 }
 0x122   : > { %v777_v20 = vsub.s32 0, %v776_v39 }
 0x124   : > { %v758_v23 = vld [vmem:[#allocation2] sm:$0xff] }
 0x125   : > { %v759_v25 = vrot.slane %v758_v23, 4 }
 0x127   : > { %v760_v27 = vadd.f32 %v759_v25, %v758_v23 }
 0x129   : > { %v761_v29 = vrot.slane %v760_v27, 2 }
 0x12b   : > { %v762_v33 = vadd.f32 %v761_v29, %v760_v27 }
 0x12d   : > { %v763_v31 = vrot.slane %v762_v33, 1 }
 0x12f   : > { %v764_v34 = vadd.f32 %v763_v31, %v762_v33 }
 0x131   : > { %v765_v35 = vmul.f32 0.00390625, %v764_v34 }
 0x133   : > { %v767_v36 = vmul.f32 %v766_v48, %v765_v35 }
 0x135   : > { %v769_v37 = vsel %vm768_vm2, %v767_v36, 0.0 }
 0x136   : > { %770 = vadd.xlane.f32.xlu0 %v769_v37 }
 0x1bf   : > { %v771_v41 = vpop.xlane.xlu0 %770 }
 0x1c0   : > { %v774_v42 = vadd.f32 %v773_v40, %v771_v41 }
 0x1c2   : > { %v778_v43 = vrot.slane %v774_v42, %v777_v20 }
 0x1c4   : > { %779 = vst [vmem:[%s1160_s7] sm:$0xff] %v778_v43 }
 0x1c5 PF: > { %s16_s24 = sadd.s32 1, %s1087_s24   ;;  %s1289_s20 = smov %s1079_s22 }
 0x1c6   : > { %p13_p9 = scmp.ge.s32.totalorder %s16_s24, 6   ;;  %s1290_s21 = smov %s1083_s23 }
 0x1c7   : > { %s1291_s22 = smov %s1294_s4  ;;  %s1292_s23 = smov %s1298_s25 }
 0x1c8   :  { %15 = sbr.rel (!%p13_p9) target bundleno = 3 (0x3), region = 80 }

</bundles_post_ra>
